<compile_context>
chip_gen: v7x
topology: tpu7x:2x2x1
jax: 0.10.0
libtpu: 0.0.40
codegen_flags: <defaults>
</compile_context>

<pallas_src>
import functools

import jax
import jax.numpy as jnp
from jax.experimental import pallas as pl
from jax.experimental.pallas import tpu as pltpu

_LANE = 128


def _cdiv(a, b):
    return -(-a // b)


def _choose_tiling(rows, tm_max=1024):
    """Pick (tm, steps) for a (rows, 128) interleaved-box array.

    tm_max=1024 rows (= 32768 boxes / step, ~1.5 MiB moved / step) keeps the
    per-step VMEM footprint (I/O double buffers + spilled intermediates) well
    under every generation's scoped-VMEM budget; bump to 2048 on v6e/v7x if
    desired.  Small problems stay a single full block (no pointless grid steps
    on single-TensorCore parts); large problems use an even, balanced step
    count so a v7x megacore shards the "parallel" axis evenly.
    """
    if rows <= tm_max:
        return rows, 1                      # one full block (always legal)
    steps = _cdiv(rows, tm_max)
    if steps % 2:
        steps += 1                          # even split for 2-TC parts (v7x)
    tm = _cdiv(_cdiv(rows, steps), 8) * 8   # multiple of 8 sublanes
    return tm, steps


def _iou_loss_kernel(pred_ref, tgt_ref, out_ref, *, loss_type, reduce_out, n):
    # pred_ref / tgt_ref : (tm, 128) f32, native row-major box data:
    #   lane l holds component (l % 4) of box (global_row*32 + l//4),
    #   components ordered (cx, cy, w, h).
    # out_ref:
    #   reduce_out=False -> (tm, 128) f32 lane-sparse loss (valid at l%4==0)
    #   reduce_out=True  -> (1, 128)  f32 masked partial sum for this block
    xp = pred_ref[...]
    xt = tgt_ref[...]

    def shl(v, k):
        # out[:, l] = v[:, l + k]  (lane rotation within each 128-lane row;
        # boxes never straddle a row since 128 % 4 == 0).
        return pltpu.roll(v, shift=(_LANE - k) % _LANE, axis=1)

    # At lanes l%4 in {0,1}: wp/wt hold (w, h); xp/xt hold (cx, cy).
    wp = shl(xp, 2)
    wt = shl(xt, 2)

    lo_p = xp - 0.5 * wp   # (x1, y1) of pred at l%4 in {0,1}
    hi_p = xp + 0.5 * wp   # (x2, y2)
    lo_t = xt - 0.5 * wt
    hi_t = xt + 0.5 * wt

    tl = jnp.maximum(lo_p, lo_t)
    br = jnp.minimum(hi_p, hi_t)
    d = br - tl
    enf = (tl < br).astype(jnp.float32)

    # All "area" quantities are valid at lanes l%4 == 0 (garbage elsewhere).
    area_i = d * shl(d, 1) * (enf * shl(enf, 1))
    area_p = wp * shl(wp, 1)                 # pred  w*h
    area_g = wt * shl(wt, 1)                 # target w*h
    area_u = area_p + area_g - area_i
    iou = area_i / (area_u + 1e-16)

    if loss_type == "iou":
        loss = 1.0 - iou * iou
    elif loss_type == "giou":
        cd = jnp.maximum(hi_p, hi_t) - jnp.minimum(lo_p, lo_t)   # (c_w, c_h)
        area_c = cd * shl(cd, 1)
        giou = iou - (area_c - area_u) / jnp.maximum(area_c, 1e-16)
        loss = 1.0 - jnp.clip(giou, -1.0, 1.0)
    else:
        raise ValueError(f"unknown loss_type: {loss_type}")

    if reduce_out:
        tm = loss.shape[0]
        lane = jax.lax.broadcasted_iota(jnp.int32, loss.shape, 1)
        row = jax.lax.broadcasted_iota(jnp.int32, loss.shape, 0) + pl.program_id(0) * tm
        box = row * 32 + lane // 4
        valid = ((lane % 4) == 0) & (box < n)   # kills interleave garbage,
        masked = jnp.where(valid, loss, 0.0)    # pad tail and OOB block rows
        out_ref[...] = jnp.sum(masked, axis=0, keepdims=True)
    else:
        out_ref[...] = loss


@functools.partial(jax.jit, static_argnames=("reduction", "loss_type"))
def iou_loss(pred, target, *, reduction="none", loss_type="iou"):
    """Pallas TPU implementation of IOUloss.forward.

    pred, target: any shape reshapable to (-1, 4) with rows (cx, cy, w, h),
                  matching `pred.view(-1, 4)` in the PyTorch module.
    """
    assert pred.shape[0] == target.shape[0]
    if loss_type not in ("iou", "giou"):
        raise ValueError(f"unknown loss_type: {loss_type}")

    pred = jnp.asarray(pred, jnp.float32).reshape(-1)
    target = jnp.asarray(target, jnp.float32).reshape(-1)
    assert pred.size == target.size and pred.size % 4 == 0
    n = pred.size // 4                     # number of boxes
    flat_len = 4 * n

    rows = _cdiv(flat_len, _LANE)
    pad = rows * _LANE - flat_len
    if pad:
        # Only hit when N % 32 != 0; pads < 32 dummy boxes (one extra HBM pass).
        pred = jnp.pad(pred, (0, pad))
        target = jnp.pad(target, (0, pad))
    # Row-major contiguous data -> layout-compatible reshape (bitcast, no copy).
    pred_il = pred.reshape(rows, _LANE)
    tgt_il = target.reshape(rows, _LANE)

    tm, steps = _choose_tiling(rows)
    reduce_out = reduction in ("mean", "sum")

    kernel = functools.partial(
        _iou_loss_kernel, loss_type=loss_type, reduce_out=reduce_out, n=n)

    if reduce_out:
        out_shape = jax.ShapeDtypeStruct((steps, _LANE), jnp.float32)
        out_spec = pl.BlockSpec((1, _LANE), lambda i: (i, 0))
    else:
        out_shape = jax.ShapeDtypeStruct((rows, _LANE), jnp.float32)
        out_spec = pl.BlockSpec((tm, _LANE), lambda i: (i, 0))

    out = pl.pallas_call(
        kernel,
        out_shape=out_shape,
        grid=(steps,),
        in_specs=[
            pl.BlockSpec((tm, _LANE), lambda i: (i, 0)),
            pl.BlockSpec((tm, _LANE), lambda i: (i, 0)),
        ],
        out_specs=out_spec,
        compiler_params=pltpu.CompilerParams(
            dimension_semantics=("parallel",),
            vmem_limit_bytes=32 * 1024 * 1024,
        ),
    )(pred_il, tgt_il)

    if reduce_out:
        total = jnp.sum(out)
        return total / n if reduction == "mean" else total
    # Lane-sparse loss -> per-box loss (one valid value every 4 lanes).
    return out.reshape(-1, 4)[:n, 0]


def _iou_loss_ref(pred, target, reduction="none", loss_type="iou"):
    """Pure-JAX reference mirroring the PyTorch module."""
    pred = jnp.asarray(pred, jnp.float32).reshape(-1, 4)
    target = jnp.asarray(target, jnp.float32).reshape(-1, 4)
    tl = jnp.maximum(pred[:, :2] - pred[:, 2:] / 2, target[:, :2] - target[:, 2:] / 2)
    br = jnp.minimum(pred[:, :2] + pred[:, 2:] / 2, target[:, :2] + target[:, 2:] / 2)
    area_p = jnp.prod(pred[:, 2:], axis=1)
    area_g = jnp.prod(target[:, 2:], axis=1)
    en = jnp.prod((tl < br).astype(tl.dtype), axis=1)
    area_i = jnp.prod(br - tl, axis=1) * en
    area_u = area_p + area_g - area_i
    iou = area_i / (area_u + 1e-16)
    if loss_type == "iou":
        loss = 1 - iou ** 2
    else:
        c_tl = jnp.minimum(pred[:, :2] - pred[:, 2:] / 2, target[:, :2] - target[:, 2:] / 2)
        c_br = jnp.maximum(pred[:, :2] + pred[:, 2:] / 2, target[:, :2] + target[:, 2:] / 2)
        area_c = jnp.prod(c_br - c_tl, axis=1)
        giou = iou - (area_c - area_u) / jnp.maximum(area_c, 1e-16)
        loss = 1 - jnp.clip(giou, -1.0, 1.0)
    if reduction == "mean":
        loss = loss.mean()
    elif reduction == "sum":
        loss = loss.sum()
    return loss


if __name__ == "__main__":
    key = jax.random.PRNGKey(0)

    def make_boxes(k, lead_shape):
        k1, k2 = jax.random.split(k)
        xy = jax.random.uniform(k1, lead_shape + (2,), minval=0.0, maxval=10.0)
        wh = jax.random.uniform(k2, lead_shape + (2,), minval=0.5, maxval=5.0)
        return jnp.concatenate([xy, wh], axis=-1)

    # (batch, anchors): small primary case plus a few layout/grid edge cases.
    cases = [
        (2, 16),      # 32 boxes   : aligned (zero-copy reshape), 1-row block
        (2, 21),      # 42 boxes   : unaligned -> tiny tail pad
        (1, 8400),    # YOLOX-ish  : single 263-row full block
        (1, 80000),   # large      : aligned, multi-step grid + partial block
    ]

    ok = True
    for (b, a) in cases:
        key, kp, kt = jax.random.split(key, 3)
        pred = make_boxes(kp, (b, a))      # (b, a, 4) -> view(-1, 4) => (b*a, 4)
        target = make_boxes(kt, (b, a))
        for loss_type in ("iou", "giou"):
            for reduction in ("none", "mean", "sum"):
                out = iou_loss(pred, target, reduction=reduction, loss_type=loss_type)
                out = jax.block_until_ready(out)
                ref = _iou_loss_ref(pred, target, reduction=reduction, loss_type=loss_type)
                if not jnp.allclose(out, ref, atol=1e-4, rtol=1e-4):
                    ok = False
                    print(f"MISMATCH n={b * a} loss_type={loss_type} reduction={reduction}")

    if ok:
        print("KERNEL_OK")
</pallas_src>

<mosaic_0001>
module attributes {stable_mosaic.version = 11 : i64} {
  func.func @_iou_loss_kernel(%arg0: i32, %arg1: memref<1x128xf32, #tpu.memory_space<vmem>>, %arg2: memref<1x128xf32, #tpu.memory_space<vmem>>, %arg3: memref<1x128xf32, #tpu.memory_space<vmem>>) attributes {dimension_semantics = [#tpu.dimension_semantics<parallel>], iteration_bounds = array<i64: 1>, scalar_prefetch = 0 : i64, scratch_operands = 0 : i64, tpu.core_type = #tpu.core_type<tc>, window_params = [{transform_indices = @transform_0, window_bounds = array<i64: 1, 128>}, {transform_indices = @transform_1, window_bounds = array<i64: 1, 128>}, {transform_indices = @transform_2, window_bounds = array<i64: 1, 128>}]} {
    %c0 = arith.constant 0 : index
    %c0_0 = arith.constant 0 : index
    %0 = vector.load %arg1[%c0, %c0_0] : memref<1x128xf32, #tpu.memory_space<vmem>>, vector<1x128xf32>
    %c0_1 = arith.constant 0 : index
    %c0_2 = arith.constant 0 : index
    %1 = vector.load %arg2[%c0_1, %c0_2] : memref<1x128xf32, #tpu.memory_space<vmem>>, vector<1x128xf32>
    %c126_i32 = arith.constant 126 : i32
    %2 = tpu.dynamic_rotate %0 by %c126_i32 dim 1 : vector<1x128xf32>, i32 -> vector<1x128xf32>
    %c126_i32_3 = arith.constant 126 : i32
    %3 = tpu.dynamic_rotate %1 by %c126_i32_3 dim 1 : vector<1x128xf32>, i32 -> vector<1x128xf32>
    %cst = arith.constant 5.000000e-01 : f32
    %4 = vector.broadcast %cst : f32 to vector<1x128xf32>
    %5 = arith.mulf %4, %2 : vector<1x128xf32>
    %6 = arith.subf %0, %5 : vector<1x128xf32>
    %cst_4 = arith.constant 5.000000e-01 : f32
    %7 = vector.broadcast %cst_4 : f32 to vector<1x128xf32>
    %8 = arith.mulf %7, %2 : vector<1x128xf32>
    %9 = arith.addf %0, %8 : vector<1x128xf32>
    %cst_5 = arith.constant 5.000000e-01 : f32
    %10 = vector.broadcast %cst_5 : f32 to vector<1x128xf32>
    %11 = arith.mulf %10, %3 : vector<1x128xf32>
    %12 = arith.subf %1, %11 : vector<1x128xf32>
    %cst_6 = arith.constant 5.000000e-01 : f32
    %13 = vector.broadcast %cst_6 : f32 to vector<1x128xf32>
    %14 = arith.mulf %13, %3 : vector<1x128xf32>
    %15 = arith.addf %1, %14 : vector<1x128xf32>
    %16 = arith.maximumf %6, %12 : vector<1x128xf32>
    %17 = arith.minimumf %9, %15 : vector<1x128xf32>
    %18 = arith.subf %17, %16 : vector<1x128xf32>
    %19 = arith.cmpf olt, %16, %17 : vector<1x128xf32>
    %20 = arith.extui %19 : vector<1x128xi1> to vector<1x128xi32>
    %21 = arith.sitofp %20 : vector<1x128xi32> to vector<1x128xf32>
    %c127_i32 = arith.constant 127 : i32
    %22 = tpu.dynamic_rotate %18 by %c127_i32 dim 1 : vector<1x128xf32>, i32 -> vector<1x128xf32>
    %23 = arith.mulf %18, %22 : vector<1x128xf32>
    %c127_i32_7 = arith.constant 127 : i32
    %24 = tpu.dynamic_rotate %21 by %c127_i32_7 dim 1 : vector<1x128xf32>, i32 -> vector<1x128xf32>
    %25 = arith.mulf %21, %24 : vector<1x128xf32>
    %26 = arith.mulf %23, %25 : vector<1x128xf32>
    %c127_i32_8 = arith.constant 127 : i32
    %27 = tpu.dynamic_rotate %2 by %c127_i32_8 dim 1 : vector<1x128xf32>, i32 -> vector<1x128xf32>
    %28 = arith.mulf %2, %27 : vector<1x128xf32>
    %c127_i32_9 = arith.constant 127 : i32
    %29 = tpu.dynamic_rotate %3 by %c127_i32_9 dim 1 : vector<1x128xf32>, i32 -> vector<1x128xf32>
    %30 = arith.mulf %3, %29 : vector<1x128xf32>
    %31 = arith.addf %28, %30 : vector<1x128xf32>
    %32 = arith.subf %31, %26 : vector<1x128xf32>
    %cst_10 = arith.constant 1.000000e-16 : f32
    %33 = vector.broadcast %cst_10 : f32 to vector<1x128xf32>
    %34 = arith.addf %32, %33 : vector<1x128xf32>
    %35 = arith.divf %26, %34 : vector<1x128xf32>
    %36 = arith.mulf %35, %35 : vector<1x128xf32>
    %cst_11 = arith.constant 1.000000e+00 : f32
    %37 = vector.broadcast %cst_11 : f32 to vector<1x128xf32>
    %38 = arith.subf %37, %36 : vector<1x128xf32>
    %c0_12 = arith.constant 0 : index
    %c0_13 = arith.constant 0 : index
    %39 = vector.load %arg3[%c0_12, %c0_13] : memref<1x128xf32, #tpu.memory_space<vmem>>, vector<1x128xf32>
    tpu.vector_store %arg3[%c0_12, %c0_13], %38 {strides = array<i32>} : memref<1x128xf32, #tpu.memory_space<vmem>>, vector<1x128xf32>,
    return
  }
  func.func @transform_0(%arg0: i32) -> (i32, i32) {
    %c0_i32 = arith.constant 0 : i32
    %c0_i32_0 = arith.constant 0 : i32
    return %arg0, %c0_i32 : i32, i32
  }
  func.func @transform_1(%arg0: i32) -> (i32, i32) {
    %c0_i32 = arith.constant 0 : i32
    %c0_i32_0 = arith.constant 0 : i32
    return %arg0, %c0_i32 : i32, i32
  }
  func.func @transform_2(%arg0: i32) -> (i32, i32) {
    %c0_i32 = arith.constant 0 : i32
    %c0_i32_0 = arith.constant 0 : i32
    return %arg0, %c0_i32 : i32, i32
  }
}

</mosaic_0001>

<bundles_post_ra>
// kernel: iou_loss.1
= control target key start
LH: loop header
LB: loop body
LE: loop exit
PB: predicated region body
PF: predicated region fallthrough
CT: control target
= control target key end

     0   :  { %s60_s11 = smov 126   ;;  %s61_s14 = smov 127   ;;  %v62_v13 = vmov 0.0   ;;  %s87_s0 = inlined_call_operand.vmem [shape: f32[1,128], index: 0, kind: input, shape index: {}]   ;;  %s88_s1 = inlined_call_operand.vmem [shape: f32[1,128], index: 1, kind: input, shape index: {}]   ;;  %s89_s2 = inlined_call_operand.vmem [shape: f32[1,128], index: 2, kind: output, shape index: {}]  }
   0x1   :  { %v11_v0 = vld [vmem:[%s87_s0] sm:$0x1] }
   0x2   :  { %13 = vrot.lane.b32.xlu0 %v11_v0, %s60_s11  ;;  %v12_v1 = vld [vmem:[%s88_s1] sm:$0x1] }
   0x6   :  { %15 = vrot.lane.b32.xlu0 %v12_v1, %s60_s11 }
  0x74   :  { %v14_v2 = vpop.permute.xlu0 %13 }
  0x75   :  { %36 = vrot.lane.b32.xlu0 %v14_v2, %s61_s14  ;;  %v17_v3 = vmul.f32 0.5, %v14_v2 }
  0x77   :  { %v18_v6 = vsub.f32 %v11_v0, %v17_v3  ;;  %v19_v7 = vadd.f32 %v17_v3, %v11_v0 }
  0x78   :  { %v16_v4 = vpop.permute.xlu0 %15 }
  0x79   :  { %v20_v5 = vmul.f32 0.5, %v16_v4 }
  0x7b   :  { %v21_v8 = vsub.f32 %v12_v1, %v20_v5  ;;  %v22_v9 = vadd.f32 %v20_v5, %v12_v1 }
  0x7d   :  { %v23_v10 = vmax.f32 %v18_v6, %v21_v8  ;;  %v24_v11 = vmin.f32 %v19_v7, %v22_v9 }
  0x7f   :  { %v25_v12 = vsub.f32 %v24_v11, %v23_v10  ;;  %vm26_vm0 = vcmp.lt.f32.partialorder %v23_v10, %v24_v11 }
  0x80   :  { %v54_v14 = vsel %vm26_vm0, 1.0, %v62_v13 }
  0x81   :  { %29 = vrot.lane.b32.xlu1 %v25_v12, %s61_s14 }
  0x85   :  { %32 = vrot.lane.b32.xlu1 %v54_v14, %s61_s14 }
  0x89   :  { %39 = vrot.lane.b32.xlu1 %v16_v4, %s61_s14 }
  0xe7   :  { %v37_v17 = vpop.permute.xlu0 %36 }
  0xe8   :  { %v38_v20 = vmul.f32 %v37_v17, %v14_v2 }
  0xf3   :  { %v30_v15 = vpop.permute.xlu1 %29 }
  0xf4   :  { %v31_v21 = vmul.f32 %v30_v15, %v25_v12 }
  0xf7   :  { %v33_v16 = vpop.permute.xlu1 %32 }
  0xf8   :  { %v34_v18 = vmul.f32 %v54_v14, %v33_v16 }
  0xfa   :  { %v35_v23 = vmul.f32 %v34_v18, %v31_v21 }
  0xfb   :  { %v40_v19 = vpop.permute.xlu1 %39 }
  0xfc   :  { %v41_v22 = vmul.f32 %v40_v19, %v16_v4 }
  0xfe   :  { %v42_v24 = vadd.f32 %v41_v22, %v38_v20 }
 0x100   :  { %v43_v25 = vsub.f32 %v42_v24, %v35_v23 }
 0x102   :  { %v44_v26 = vadd.f32 1e-16, %v43_v25 }
 0x104   :  { %58 = vrcp.f32 %v44_v26 }
 0x10e   :  { %v59_v27 = vpop.eup %58 }
 0x10f   :  { %v46_v28 = vmul.f32 %v59_v27, %v35_v23 }
 0x111   :  { %v47_v29 = vmul.f32 %v46_v28, %v46_v28 }
 0x113   :  { %v48_v30 = vsub.f32 1.0, %v47_v29 }
 0x115   :  { %49 = vst [vmem:[%s89_s2] sm:$0x1] %v48_v30 }

</bundles_post_ra>
